<compile_context>
chip_gen: v6e
topology: v6e:2x2x1
jax: 0.10.0
libtpu: 0.0.40
codegen_flags: <defaults>
</compile_context>

<pallas_src>
import functools
import math

import jax
import jax.numpy as jnp
import numpy as np
from jax.experimental import pallas as pl
from jax.experimental.pallas import tpu as pltpu


def _round_up(x, m):
    return (x + m - 1) // m * m


def _cdiv(a, b):
    return (a + b - 1) // b


def _sine_pos_kernel(pos_ref, const_ref, out_ref, *, r):
    """One packed tile.

    pos_ref   : (TMP, 2r) f32, row i holds [x0,y0,x1,y1,...] of points i*r..i*r+r-1
    const_ref : (4, W) f32 with W = r*feat_size:
                row 0 = scale/period multipliers (tiled [w,w,w,w] per point)
                row 1 = 1.0 on y-lanes, 0.0 on x-lanes
                row 2 = group id (which of the r packed points owns this lane)
                row 3 = 1.0 on cos-lanes, 0.0 on sin-lanes
    out_ref   : (TMP, W) — lane-dense packed output block.
    """
    pos = pos_ref[...]                         # (TMP, 2r)
    w_full = const_ref[0:1, :]                 # (1, W)
    ysel = const_ref[1:2, :] > 0.5             # (1, W) bool
    gid = const_ref[2:3, :]                    # (1, W) float group id
    csel = const_ref[3:4, :] > 0.5             # (1, W) bool

    # Spread the 2r per-row coordinates across the full W lanes with selects
    # (static unroll over the r packed points; r == 1 degenerates cleanly).
    coord = None
    for j in range(r):
        xj = pos[:, 2 * j:2 * j + 1]           # (TMP, 1)
        yj = pos[:, 2 * j + 1:2 * j + 2]       # (TMP, 1)
        cj = jnp.where(ysel, yj, xj)           # (TMP, W) full-width select
        if coord is None:
            coord = cj
        else:
            coord = jnp.where(gid == float(j), cj, coord)

    ang = coord * w_full                       # (TMP, W) exact f32 multiply (VPU)
    # Full-width sin + cos merged by the cos-lane mask; ONE unmasked store.
    out_ref[...] = jnp.where(csel, jnp.cos(ang), jnp.sin(ang)).astype(out_ref.dtype)


def sine_pos_encoder_2d(pos_xy, feat_size, normalize=False,
                        scale_factor=2.0 * math.pi, max_period=10000.0,
                        out_dtype=jnp.float32, block_bytes=2 << 20):
    """Pallas TPU implementation of SinePosEncoder2d.forward (normalize=False)."""
    if feat_size % 4 != 0:
        raise ValueError(f"feat_size (got {feat_size}) must be divisible by 4.")
    if normalize:
        # TODO(synk): torch normalize branch broadcasts [N,2]-[N] (only shape-valid for N==2); not replicated.
        raise NotImplementedError("normalize=True path not implemented")

    num_pts = pos_xy.shape[0]
    assert pos_xy.shape == (num_pts, 2)
    f4 = feat_size // 4

    # Lane-dense packing factor: r points per output row when feat_size < 128.
    if feat_size < 128 and 128 % feat_size == 0:
        r = 128 // feat_size
    else:
        r = 1
    W = r * feat_size

    # --- host-side constants (one (4, W) f32 block, DMA'd once) --------------
    k = np.arange(f4, dtype=np.float64)
    w = (scale_factor * max_period ** (-4.0 * k / float(feat_size))).astype(np.float32)
    quarter = np.repeat(np.arange(4), f4)                       # (F,) 0..3
    w_full = np.tile(np.tile(w, 4), r)                          # (W,)
    ysel = np.tile((quarter >= 2).astype(np.float32), r)        # (W,) y-lanes
    csel = np.tile((quarter % 2 == 1).astype(np.float32), r)    # (W,) cos-lanes
    gid = np.repeat(np.arange(r, dtype=np.float32), feat_size)  # (W,) packed-point id
    consts = jnp.asarray(np.stack([w_full, ysel, gid, csel], axis=0))  # (4, W)

    # --- input packing: (N, 2) -> (N/r, 2r) (free row-major reshape) ---------
    pos_f = pos_xy.astype(jnp.float32)
    n_pad_pts = _round_up(max(num_pts, 1), r)
    if n_pad_pts != num_pts:
        # Tiny input pad (<= r-1 rows); only hit when feat_size < 128 and N % r != 0.
        pos_f = jnp.pad(pos_f, ((0, n_pad_pts - num_pts), (0, 0)))
    n_rows = n_pad_pts // r
    pos_packed = pos_f.reshape(n_rows, 2 * r)

    # --- feat_size-aware tile: ~block_bytes per output block, >= ~4 grid steps
    bytes_per_row = W * jnp.dtype(out_dtype).itemsize
    tmp = _round_up(max(1, block_bytes // bytes_per_row), 8)
    tmp = max(8, min(tmp, _round_up(_cdiv(n_rows, 4), 8)))      # keep megacore busy
    grid_steps = _cdiv(n_rows, tmp)                             # ragged last block OK

    kernel = functools.partial(_sine_pos_kernel, r=r)

    out_packed = pl.pallas_call(
        kernel,
        out_shape=jax.ShapeDtypeStruct((n_rows, W), out_dtype),
        grid_spec=pltpu.PrefetchScalarGridSpec(
            num_scalar_prefetch=0,
            grid=(grid_steps,),
            in_specs=[
                pl.BlockSpec((tmp, 2 * r), lambda i: (i, 0)),   # packed point tile
                pl.BlockSpec((4, W), lambda i: (0, 0)),         # constant rows
            ],
            out_specs=pl.BlockSpec((tmp, W), lambda i: (i, 0)),
        ),
        compiler_params=pltpu.CompilerParams(
            dimension_semantics=("parallel",),                  # megacore shard (v7x)
        ),
    )(pos_packed, consts)

    # Free row-major view back to (n_pad_pts, feat_size).
    out = out_packed.reshape(n_pad_pts, feat_size)
    if n_pad_pts != num_pts:
        # TODO(synk): this slice costs one extra output pass; only for N % r != 0 at feat_size < 128.
        out = out[:num_pts]
    return out


def _reference(pos_xy, feat_size, scale_factor=2.0 * math.pi, max_period=10000.0):
    """Pure-JAX mirror of the torch forward (normalize=False)."""
    pos_xy = scale_factor * pos_xy.astype(jnp.float32)
    periods = 4.0 * jnp.arange(feat_size // 4, dtype=jnp.float32) / feat_size
    periods = max_period ** periods
    pos_feats = pos_xy[:, :, None] / periods                     # (N, 2, F/4)
    pos_feats = jnp.concatenate([jnp.sin(pos_feats), jnp.cos(pos_feats)], axis=2)
    return pos_feats.reshape(-1, feat_size)


if __name__ == "__main__":
    key = jax.random.PRNGKey(0)
    num_pts, feat_size = 200, 32
    # Normalized-coordinate-style positions in [0, 1).
    pos_xy = jax.random.uniform(key, (num_pts, 2), dtype=jnp.float32)

    # F=32 -> r=4 packed points/row, W=128 lane-dense output; 4 grid steps with a
    # ragged last block (50 packed rows, 16-row tiles) to exercise the clip path.
    out = sine_pos_encoder_2d(pos_xy, feat_size)
    out = jax.block_until_ready(out)

    ref = _reference(pos_xy, feat_size)
    assert out.shape == (num_pts, feat_size)
    assert jnp.allclose(out, ref, atol=1e-5, rtol=1e-5), "mismatch vs reference"
    print("KERNEL_OK")
</pallas_src>

<mosaic_0001>
module attributes {stable_mosaic.version = 11 : i64} {
  func.func @_sine_pos_kernel(%arg0: i32, %arg1: memref<16x8xf32, #tpu.memory_space<vmem>>, %arg2: memref<4x128xf32, #tpu.memory_space<vmem>>, %arg3: memref<16x128xf32, #tpu.memory_space<vmem>>) attributes {dimension_semantics = [#tpu.dimension_semantics<parallel>], iteration_bounds = array<i64: 4>, scalar_prefetch = 0 : i64, scratch_operands = 0 : i64, tpu.core_type = #tpu.core_type<tc>, window_params = [{transform_indices = @transform_0, window_bounds = array<i64: 16, 8>}, {pipeline_mode = #tpu.pipeline_mode<synchronous>, transform_indices = @transform_1, window_bounds = array<i64: 4, 128>}, {transform_indices = @transform_2, window_bounds = array<i64: 16, 128>}]} {
    %c0 = arith.constant 0 : index
    %c0_0 = arith.constant 0 : index
    %0 = vector.load %arg1[%c0, %c0_0] : memref<16x8xf32, #tpu.memory_space<vmem>>, vector<16x8xf32>
    %c0_1 = arith.constant 0 : index
    %c0_2 = arith.constant 0 : index
    %1 = vector.load %arg2[%c0_1, %c0_2] : memref<4x128xf32, #tpu.memory_space<vmem>>, vector<1x128xf32>
    %c1 = arith.constant 1 : index
    %c0_3 = arith.constant 0 : index
    %2 = vector.load %arg2[%c1, %c0_3] : memref<4x128xf32, #tpu.memory_space<vmem>>, vector<1x128xf32>
    %cst = arith.constant 5.000000e-01 : f32
    %3 = vector.broadcast %cst : f32 to vector<1x128xf32>
    %4 = arith.cmpf ogt, %2, %3 : vector<1x128xf32>
    %c2 = arith.constant 2 : index
    %c0_4 = arith.constant 0 : index
    %5 = vector.load %arg2[%c2, %c0_4] : memref<4x128xf32, #tpu.memory_space<vmem>>, vector<1x128xf32>
    %c3 = arith.constant 3 : index
    %c0_5 = arith.constant 0 : index
    %6 = vector.load %arg2[%c3, %c0_5] : memref<4x128xf32, #tpu.memory_space<vmem>>, vector<1x128xf32>
    %cst_6 = arith.constant 5.000000e-01 : f32
    %7 = vector.broadcast %cst_6 : f32 to vector<1x128xf32>
    %8 = arith.cmpf ogt, %6, %7 : vector<1x128xf32>
    %9 = vector.extract_strided_slice %0 {offsets = [0, 0], sizes = [16, 1], strides = [1, 1]} : vector<16x8xf32> to vector<16x1xf32>
    %10 = vector.extract_strided_slice %0 {offsets = [0, 1], sizes = [16, 1], strides = [1, 1]} : vector<16x8xf32> to vector<16x1xf32>
    %11 = vector.shape_cast %4 : vector<1x128xi1> to vector<1x128xi1>
    %12 = vector.broadcast %11 : vector<1x128xi1> to vector<16x128xi1>
    %13 = vector.shape_cast %10 : vector<16x1xf32> to vector<16x1xf32>
    %14 = vector.broadcast %13 : vector<16x1xf32> to vector<16x128xf32>
    %15 = vector.shape_cast %9 : vector<16x1xf32> to vector<16x1xf32>
    %16 = vector.broadcast %15 : vector<16x1xf32> to vector<16x128xf32>
    %17 = arith.select %12, %14, %16 : vector<16x128xi1>, vector<16x128xf32>
    %18 = vector.extract_strided_slice %0 {offsets = [0, 2], sizes = [16, 1], strides = [1, 1]} : vector<16x8xf32> to vector<16x1xf32>
    %19 = vector.extract_strided_slice %0 {offsets = [0, 3], sizes = [16, 1], strides = [1, 1]} : vector<16x8xf32> to vector<16x1xf32>
    %20 = vector.shape_cast %4 : vector<1x128xi1> to vector<1x128xi1>
    %21 = vector.broadcast %20 : vector<1x128xi1> to vector<16x128xi1>
    %22 = vector.shape_cast %19 : vector<16x1xf32> to vector<16x1xf32>
    %23 = vector.broadcast %22 : vector<16x1xf32> to vector<16x128xf32>
    %24 = vector.shape_cast %18 : vector<16x1xf32> to vector<16x1xf32>
    %25 = vector.broadcast %24 : vector<16x1xf32> to vector<16x128xf32>
    %26 = arith.select %21, %23, %25 : vector<16x128xi1>, vector<16x128xf32>
    %cst_7 = arith.constant 1.000000e+00 : f32
    %27 = vector.broadcast %cst_7 : f32 to vector<1x128xf32>
    %28 = arith.cmpf oeq, %5, %27 : vector<1x128xf32>
    %29 = vector.shape_cast %28 : vector<1x128xi1> to vector<1x128xi1>
    %30 = vector.broadcast %29 : vector<1x128xi1> to vector<16x128xi1>
    %31 = arith.select %30, %26, %17 : vector<16x128xi1>, vector<16x128xf32>
    %32 = vector.extract_strided_slice %0 {offsets = [0, 4], sizes = [16, 1], strides = [1, 1]} : vector<16x8xf32> to vector<16x1xf32>
    %33 = vector.extract_strided_slice %0 {offsets = [0, 5], sizes = [16, 1], strides = [1, 1]} : vector<16x8xf32> to vector<16x1xf32>
    %34 = vector.shape_cast %4 : vector<1x128xi1> to vector<1x128xi1>
    %35 = vector.broadcast %34 : vector<1x128xi1> to vector<16x128xi1>
    %36 = vector.shape_cast %33 : vector<16x1xf32> to vector<16x1xf32>
    %37 = vector.broadcast %36 : vector<16x1xf32> to vector<16x128xf32>
    %38 = vector.shape_cast %32 : vector<16x1xf32> to vector<16x1xf32>
    %39 = vector.broadcast %38 : vector<16x1xf32> to vector<16x128xf32>
    %40 = arith.select %35, %37, %39 : vector<16x128xi1>, vector<16x128xf32>
    %cst_8 = arith.constant 2.000000e+00 : f32
    %41 = vector.broadcast %cst_8 : f32 to vector<1x128xf32>
    %42 = arith.cmpf oeq, %5, %41 : vector<1x128xf32>
    %43 = vector.shape_cast %42 : vector<1x128xi1> to vector<1x128xi1>
    %44 = vector.broadcast %43 : vector<1x128xi1> to vector<16x128xi1>
    %45 = arith.select %44, %40, %31 : vector<16x128xi1>, vector<16x128xf32>
    %46 = vector.extract_strided_slice %0 {offsets = [0, 6], sizes = [16, 1], strides = [1, 1]} : vector<16x8xf32> to vector<16x1xf32>
    %47 = vector.extract_strided_slice %0 {offsets = [0, 7], sizes = [16, 1], strides = [1, 1]} : vector<16x8xf32> to vector<16x1xf32>
    %48 = vector.shape_cast %4 : vector<1x128xi1> to vector<1x128xi1>
    %49 = vector.broadcast %48 : vector<1x128xi1> to vector<16x128xi1>
    %50 = vector.shape_cast %47 : vector<16x1xf32> to vector<16x1xf32>
    %51 = vector.broadcast %50 : vector<16x1xf32> to vector<16x128xf32>
    %52 = vector.shape_cast %46 : vector<16x1xf32> to vector<16x1xf32>
    %53 = vector.broadcast %52 : vector<16x1xf32> to vector<16x128xf32>
    %54 = arith.select %49, %51, %53 : vector<16x128xi1>, vector<16x128xf32>
    %cst_9 = arith.constant 3.000000e+00 : f32
    %55 = vector.broadcast %cst_9 : f32 to vector<1x128xf32>
    %56 = arith.cmpf oeq, %5, %55 : vector<1x128xf32>
    %57 = vector.shape_cast %56 : vector<1x128xi1> to vector<1x128xi1>
    %58 = vector.broadcast %57 : vector<1x128xi1> to vector<16x128xi1>
    %59 = arith.select %58, %54, %45 : vector<16x128xi1>, vector<16x128xf32>
    %60 = vector.broadcast %1 : vector<1x128xf32> to vector<16x128xf32>
    %61 = arith.mulf %59, %60 : vector<16x128xf32>
    %62 = math.cos %61 : vector<16x128xf32>
    %63 = math.sin %61 : vector<16x128xf32>
    %64 = vector.shape_cast %8 : vector<1x128xi1> to vector<1x128xi1>
    %65 = vector.broadcast %64 : vector<1x128xi1> to vector<16x128xi1>
    %66 = arith.select %65, %62, %63 : vector<16x128xi1>, vector<16x128xf32>
    %c0_10 = arith.constant 0 : index
    %c0_11 = arith.constant 0 : index
    %67 = vector.load %arg3[%c0_10, %c0_11] : memref<16x128xf32, #tpu.memory_space<vmem>>, vector<16x128xf32>
    tpu.vector_store %arg3[%c0_10, %c0_11], %66 {strides = array<i32>} : memref<16x128xf32, #tpu.memory_space<vmem>>, vector<16x128xf32>,
    return
  }
  func.func @transform_0(%arg0: i32) -> (i32, i32) {
    %c0_i32 = arith.constant 0 : i32
    %c0_i32_0 = arith.constant 0 : i32
    return %arg0, %c0_i32 : i32, i32
  }
  func.func @transform_1(%arg0: i32) -> (i32, i32) {
    %c0_i32 = arith.constant 0 : i32
    %c0_i32_0 = arith.constant 0 : i32
    %c0_i32_1 = arith.constant 0 : i32
    return %c0_i32, %c0_i32_0 : i32, i32
  }
  func.func @transform_2(%arg0: i32) -> (i32, i32) {
    %c0_i32 = arith.constant 0 : i32
    %c0_i32_0 = arith.constant 0 : i32
    return %arg0, %c0_i32 : i32, i32
  }
}

</mosaic_0001>

<bundles_post_ra>
// kernel: tpu_custom_call.1
= control target key start
LH: loop header
LB: loop body
LE: loop exit
PB: predicated region body
PF: predicated region fallthrough
CT: control target
= control target key end

     0   :  { %7 = vsyncpa [#allocation3], 0  ;;  %s1283_s0 = inlined_call_operand.vmem [shape: f32[50,8], index: 0, kind: input, shape index: {}]   ;;  %s1284_s1 = inlined_call_operand.vmem [shape: f32[4,128], index: 1, kind: input, shape index: {}]   ;;  %s1285_s2 = inlined_call_operand.hbm [shape: f32[50,128], index: 2, kind: output, shape index: {}]  }
   0x1   :  { %9 = vsyncpa [#allocation3 + $0x1], 0  ;;  %s1007_s9 = smov 0   ;;  %s1009_s10 = smov 0  }
   0x2   :  { %s1011_s11 = smov 0   ;;  %s1013_s12 = smov 0  }
   0x3 LB: > { %s1028_s13 = sadd.s32 4294967295, %s973_s12   ;;  %s796_s14 = sadd.s32 4294967294, %s973_s12   ;;  %s973_s12 = sphi %s1013_s12, %s1303_s12   ;;  %s969_s11 = sphi %s1011_s11, %s1302_s11   ;;  %s965_s10 = sphi %s1009_s10, %s1301_s10   ;;  %s961_s9 = sphi %s1007_s9, %s1300_s9  }
   0x4   : > { %s1032_s15 = sadd.s32 1, %s973_s12   ;;  %s69_s16 = sadd.s32 1, %s969_s11 }
   0x5   : > { %s66_s17 = ssub.s32 %s973_s12, %s1032_s15  ;;  %p79_p0 = scmp.ne.s32.totalorder %s969_s11, %s965_s10 }
   0x6   : > { %p67_p1 = scmp.eq.s32.totalorder %s66_s17, 0  ;;  %p80_p2 = scmp.eq.s32.totalorder %s1028_s13, 3 }
   0x7   : > { %p85_p3 = scmp.ne.s32.totalorder %s965_s10, %s961_s9  ;;  %p86_p4 = scmp.eq.s32.totalorder %s796_s14, 3 }
   0x8   : > { %s1043_s18 = scalar_select %p67_p1, %s969_s11, %s69_s16  }
   0x9   : > { %p1045_p5 = por %p80_p2, %p79_p0  ;;  %p1049_p6 = por %p86_p4, %p85_p3 }
   0xa   : > { %p799_p7 = scmp.ge.s32.totalorder %s973_s12, 1  ;;  %p124_p8 = scmp.lt.s32.totalorder %s973_s12, 5 }
   0xc   : > { %p125_p9 = pnand %p799_p7, %p124_p8 }
   0xd   : > { %s1060_s23 = sshll.u32 (!%p125_p9), %s1028_s13, 1  ;;  %s147_s29 = sand.u32 (!%p125_p9), 1, %s965_s10  }
   0xe   : > { %128 = sbr.rel (%p125_p9) target bundleno = 312 (0x138), region = 28  ;;  %p155_p10 = scmp.lt.s32.totalorder (!%p125_p9), %s1060_s23, 6 }
   0xf   : > { %s800_s8 = sshll.u32 (!%p125_p9), %s147_s29, 4  ;;  %s1223_s16 = scalar_lea.sflag (!%p125_p9), [#allocation3], %s147_s29 }
  0x10   : > { %s1214_s14 = scalar_lea.vmem (!%p125_p9), [#allocation2], %s800_s8 }
  0x13   : > { %v178_v0 = vlaneseq  ;;  %v175_v1 = vld [vmem:[%s1284_s1 + $0x3] sm:$0x1]  ;;  %v975_v2 = vmov 1   ;;  %v976_v3 = vmov 0   ;;  %s156_s24 = scalar_select %p155_p10, %s1060_s23, 6  ;;  %v977_v10 = vmov 3  }
  0x14   : > { %892 = vset.pattern.permute.xlu0 %v975_v2  ;;  %893 = vset.pattern.permute.xlu1 %v976_v3  ;;  %vm176_vm0 = vcmp.gt.f32.partialorder %v175_v1, 0.5  ;;  %v978_v11 = vmov 2   ;;  %v979_v12 = vmov 5   ;;  %v980_v13 = vmov 4   ;;  %v172_v23 = vld [vmem:[%s1284_s1 + $0x1] sm:$0x1] }
  0x15   : > { %v179_v4 = vshrl.u32 %v178_v0, 7  ;;  %v1064_v5 = vsel %vm176_vm0, 1, %v976_v3  ;;  %s802_s25 = sshll.u32 %s156_s24, 3  ;;  %v981_v14 = vmov 7   ;;  %v982_v15 = vmov 6   ;;  %s723_s17 = ssub.s32 (%p1045_p5), 7, %s1060_s23 }
  0x16   : > { %s158_s28 = scalar_lea.vmem %s1283_s0, %s802_s25  ;;  %v174_v25 = vld [vmem:[%s1284_s1 + $0x2] sm:$0x1]  ;;  %vm173_vm1 = vcmp.gt.f32.partialorder %v172_v23, 0.5  ;;  %v803_v47 = vld [vmem:[%s1284_s1] ss:$0 sm:$0xff]  ;;  %p724_p11 = scmp.lt.s32.totalorder (%p1045_p5), %s723_s17, 2 }
  0x17   : > { %v1066_v6 = vsub.s32 0, %v179_v4  ;;  %v169_v8 = vld [vmem:[%s158_s28] sm:$0xff]  ;;  %v170_v9 = vld [vmem:[%s158_s28 + $0x8] sm:$0xff]  ;;  %vm221_vm2 = vcmp.eq.f32.partialorder %v174_v25, 1.0  ;;  %vm248_vm3 = vcmp.eq.f32.partialorder %v174_v25, 2.0  ;;  %v177_v27 = vsel %vm173_vm1, 1, %v976_v3 }
  0x18   : > { %194 = vperm.xlu1 %893, %v169_v8   ;;  %185 = vperm.xlu0 %892, %v169_v8   ;;  %vm275_vm4 = vcmp.eq.f32.partialorder %v174_v25, 3.0  ;;  %v222_v29 = vsel %vm221_vm2, 1, %v976_v3  ;;  %v249_v31 = vsel %vm248_vm3, 1, %v976_v3 }
  0x19   : > { %v708_v7 = vrot.slane %v1064_v5, %v1066_v6  ;;  %v181_v32 = vrot.slane %v177_v27, %v1066_v6  ;;  %v276_v33 = vsel %vm275_vm4, 1, %v976_v3  ;;  %v226_v34 = vrot.slane %v222_v29, %v1066_v6 }
  0x1a   : > { %v253_v35 = vrot.slane %v249_v31, %v1066_v6  ;;  %v280_v38 = vrot.slane %v276_v33, %v1066_v6 }
  0x1b   : > { %vm1089_vm5 = vcmp.eq.s32.totalorder %v181_v32, 1  ;;  %vm1093_vm6 = vcmp.eq.s32.totalorder %v226_v34, 1 }
  0x1c   : > { %198 = vperm.xlu1 %893, %v170_v9   ;;  %190 = vperm.xlu0 %892, %v170_v9   ;;  %vm1099_vm7 = vcmp.eq.s32.totalorder %v253_v35, 1  ;;  %vm1107_vm8 = vcmp.eq.s32.totalorder %v280_v38, 1  ;;  %v988_v35 = vmov 1326507024  }
  0x20   : > { %895 = vset.pattern.permute.xlu1 %v977_v10  ;;  %894 = vset.pattern.permute.xlu0 %v977_v10 }
  0x21   : > { %208 = vperm.xlu1 %895, %v170_v9   ;;  %204 = vperm.xlu0 %894, %v169_v8  }
  0x25   : > { %896 = vset.pattern.permute.xlu1 %v978_v11  ;;  %897 = vset.pattern.permute.xlu0 %v978_v11 }
  0x26   : > { %212 = vperm.xlu1 %896, %v169_v8   ;;  %216 = vperm.xlu0 %897, %v170_v9  }
  0x2a   : > { %898 = vset.pattern.permute.xlu1 %v979_v12  ;;  %899 = vset.pattern.permute.xlu0 %v980_v13 }
  0x2b   : > { %231 = vperm.xlu1 %898, %v169_v8   ;;  %239 = vperm.xlu0 %899, %v169_v8  }
  0x2f   : > { %235 = vperm.xlu1 %898, %v170_v9   ;;  %902 = vset.pattern.permute.xlu0 %v981_v14 }
  0x30   : > { %262 = vperm.xlu0 %902, %v170_v9  }
  0x33   : > { %900 = vset.pattern.permute.xlu1 %v980_v13 }
  0x34   : > { %243 = vperm.xlu1 %900, %v170_v9   ;;  %904 = vset.pattern.permute.xlu0 %v982_v15 }
  0x38   : > { %901 = vset.pattern.permute.xlu1 %v981_v14 }
  0x39   : > { %258 = vperm.xlu1 %901, %v169_v8  }
  0x3d   : > { %903 = vset.pattern.permute.xlu1 %v982_v15 }
  0x3e   : > { %266 = vperm.xlu1 %903, %v169_v8  }
  0x42   : > { %270 = vperm.xlu1 %903, %v170_v9  }
  0x93   : > { %v195_v16 = vpop.permute.xlu1 %194  ;;  %v186_v19 = vpop.permute.xlu0 %185 }
  0x94   : > { %v201_v44 = vsel %vm1089_vm5, %v186_v19, %v195_v16 }
  0x97   : > { %v199_v17 = vpop.permute.xlu1 %198  ;;  %v191_v21 = vpop.permute.xlu0 %190 }
  0x98   : > { %v202_v56 = vsel %vm1089_vm5, %v191_v21, %v199_v17 }
  0x9c   : > { %v209_v18 = vpop.permute.xlu1 %208  ;;  %v205_v24 = vpop.permute.xlu0 %204 }
  0xa1   : > { %v213_v20 = vpop.permute.xlu1 %212  ;;  %v217_v28 = vpop.permute.xlu0 %216 }
  0xa2   : > { %v219_v41 = vsel %vm1089_vm5, %v205_v24, %v213_v20  ;;  %v220_v51 = vsel %vm1089_vm5, %v209_v18, %v217_v28  ;;  %v983_v18 = vmov 683565275   ;;  %v985_v24 = vmov 2131351028  }
  0xa3   : > { %v228_v46 = vsel %vm1093_vm6, %v219_v41, %v201_v44  ;;  %v229_v58 = vsel %vm1093_vm6, %v220_v51, %v202_v56  ;;  %v987_v28 = vmov 920167782  }
  0xa6   : > { %v232_v22 = vpop.permute.xlu1 %231  ;;  %v240_v36 = vpop.permute.xlu0 %239 }
  0xa7   : > { %v246_v43 = vsel %vm1089_vm5, %v232_v22, %v240_v36  ;;  %v984_v22 = vmov 2475754826  }
  0xa8   : > { %v255_v49 = vsel %vm1099_vm7, %v246_v43, %v228_v46 }
  0xaa   : > { %v236_v26 = vpop.permute.xlu1 %235 }
  0xab   : > { %v263_v55 = vpop.permute.xlu0 %262 }
  0xaf   : > { %v244_v30 = vpop.permute.xlu1 %243 }
  0xb0   : > { %v247_v53 = vsel %vm1089_vm5, %v236_v26, %v244_v30  ;;  %v986_v26 = vmov 2102212464  }
  0xb1   : > { %v256_v61 = vsel %vm1099_vm7, %v247_v53, %v229_v58 }
  0xb4   : > { %v259_v37 = vpop.permute.xlu1 %258 }
  0xb9   : > { %v267_v48 = vpop.permute.xlu1 %266 }
  0xba   : > { %v273_v50 = vsel %vm1089_vm5, %v259_v37, %v267_v48 }
  0xbb   : > { %v282_v52 = vsel %vm1107_vm8, %v273_v50, %v255_v49 }
  0xbc   : > { %v1126_v54 = vmul.f32 %v803_v47, %v282_v52 }
  0xbd   : > { %v271_v57 = vpop.permute.xlu1 %270 }
  0xbe   : > { %v290_v59 = vand.u32 2147483647, %v1126_v54  ;;  %v293_v60 = vand.u32 2139095040, %v1126_v54  ;;  %v274_v62 = vsel %vm1089_vm5, %v263_v55, %v271_v57  ;;  %vm292_vm7 = vcmp.lt.s32.totalorder %v1126_v54, 0 }
  0xbf   : > { %v283_v0 = vsel %vm1107_vm8, %v274_v62, %v256_v61 }
  0xc0   : > { %v294_v63 = vshrl.u32 %v293_v60, 23  ;;  %v297_v1 = vand.u32 8388607, %v290_v59  ;;  %v1142_v2 = vmul.f32 %v803_v47, %v283_v0  ;;  %vm291_vm8 = vcmp.le.f32.partialorder %v290_v59, 0.7853982 }
  0xc2   : > { %v804_v3 = vadd.s32 4294967169, %v294_v63  ;;  %v396_v4 = vand.u32 2139095040, %v1142_v2  ;;  %v298_v9 = vor.u32 8388608, %v297_v1  ;;  %v393_v11 = vand.u32 2147483647, %v1142_v2 }
  0xc4   : > { %v300_v8 = vadd.s32 1, %v804_v3  ;;  %v397_v10 = vshrl.u32 %v396_v4, 23  ;;  %v1146_v16 = vshll.u32 %v298_v9, 8  ;;  %v400_v20 = vand.u32 8388607, %v393_v11 }
  0xc6   : > { %vm301_vm9 = vcmp.gt.s32.totalorder %v300_v8, 0  ;;  %v808_v13 = vadd.s32 4294967169, %v397_v10  ;;  %v401_v50 = vor.u32 8388608, %v400_v20 }
  0xc7   : > { %v302_v12 = vsel %vm301_vm9, %v300_v8, 0  ;;  %vm395_vm9 = vcmp.lt.s32.totalorder %v1142_v2, 0 }
  0xc8   : > { %v303_v14 = vshrl.u32 %v302_v12, 5  ;;  %v304_v15 = vand.u32 31, %v302_v12  ;;  %v403_v21 = vadd.s32 1, %v808_v13  ;;  %v441_v1 = vshll.u32 %v401_v50, 8 }
  0xca   : > { %v305_v17 = vsub.s32 32, %v304_v15  ;;  %v307_v19 = vshll.u32 %v983_v18, %v304_v15  ;;  %v310_v23 = vshll.u32 %v984_v22, %v304_v15  ;;  %v313_v25 = vshll.u32 %v985_v24, %v304_v15 }
  0xcb   : > { %v316_v27 = vshll.u32 %v986_v26, %v304_v15  ;;  %v319_v29 = vshll.u32 %v987_v28, %v304_v15  ;;  %vm322_vm10 = vcmp.lt.s32.totalorder %v303_v14, 1  ;;  %vm324_vm11 = vcmp.lt.s32.totalorder %v303_v14, 3 }
  0xcc   : > { %v308_v30 = vshrl.u32 %v984_v22, %v305_v17  ;;  %v311_v31 = vshrl.u32 %v985_v24, %v305_v17  ;;  %v314_v32 = vshrl.u32 %v986_v26, %v305_v17  ;;  %v306_v33 = vshrl.u32 %v983_v18, %v305_v17 }
  0xcd   : > { %v317_v34 = vshrl.u32 %v987_v28, %v305_v17  ;;  %v320_v36 = vshrl.u32 %v988_v35, %v305_v17  ;;  %vm404_vm12 = vcmp.gt.s32.totalorder %v403_v21, 0  ;;  %vm325_vm13 = vcmp.lt.s32.totalorder %v303_v14, 4 }
  0xce   : > { %v309_v37 = vor.u32 %v308_v30, %v307_v19  ;;  %v312_v38 = vor.u32 %v311_v31, %v310_v23  ;;  %v315_v39 = vor.u32 %v314_v32, %v313_v25  ;;  %v405_v42 = vsel %vm404_vm12, %v403_v21, 0 }
  0xcf   : > { %v318_v40 = vor.u32 %v317_v34, %v316_v27  ;;  %v321_v41 = vor.u32 %v320_v36, %v319_v29  ;;  %vm323_vm14 = vcmp.lt.s32.totalorder %v303_v14, 2  ;;  %v407_v53 = vand.u32 31, %v405_v42 }
  0xd0   : > { %v326_v43 = vsel %vm322_vm10, %v306_v33, %v309_v37  ;;  %v327_v44 = vsel %vm325_vm13, %v315_v39, 2102212464  ;;  %v330_v45 = vsel %vm322_vm10, %v309_v37, %v312_v38  ;;  %v334_v46 = vsel %vm322_vm10, %v312_v38, %v315_v39 }
  0xd1   : > { %v328_v47 = vsel %vm324_vm11, %v312_v38, %v327_v44  ;;  %v331_v48 = vsel %vm325_vm13, %v318_v40, 920167782  ;;  %v335_v49 = vsel %vm325_vm13, %v321_v41, 1326507024  ;;  %v406_v63 = vshrl.u32 %v405_v42, 5 }
  0xd2   : > { %v332_v51 = vsel %vm324_vm11, %v315_v39, %v331_v48  ;;  %v336_v52 = vsel %vm324_vm11, %v318_v40, %v335_v49  ;;  %v329_v55 = vsel %vm323_vm14, %v326_v43, %v328_v47  ;;  %v408_v0 = vsub.s32 32, %v407_v53 }
  0xd3   : > { %v333_v56 = vsel %vm323_vm14, %v330_v45, %v332_v51  ;;  %v337_v57 = vsel %vm323_vm14, %v334_v46, %v336_v52  ;;  %v345_v3 = vmul.u32 %v1146_v16, %v329_v55  ;;  %v410_v4 = vshll.u32 %v983_v18, %v407_v53 }
  0xd4   : > { %v1159_v58 = vmul.u32.u64.low %v1146_v16, %v337_v57  ;;  %v1160_v60 = vmul.u32.u64.high %v1146_v16, %v337_v57, %v1159_v58  ;;  %v1163_v61 = vmul.u32.u64.low %v1146_v16, %v333_v56  ;;  %v1164_v62 = vmul.u32.u64.high %v1146_v16, %v333_v56, %v1163_v61 }
  0xd5   : > { %v413_v8 = vshll.u32 %v984_v22, %v407_v53  ;;  %v416_v9 = vshll.u32 %v985_v24, %v407_v53  ;;  %v411_v10 = vshrl.u32 %v984_v22, %v408_v0  ;;  %v414_v12 = vshrl.u32 %v985_v24, %v408_v0 }
  0xd6   : > { %v417_v13 = vshrl.u32 %v986_v26, %v408_v0  ;;  %v419_v14 = vshll.u32 %v986_v26, %v407_v53  ;;  %vm347_vm15 = vc.u32 %v1160_v60, %v1163_v61  ;;  %v348_v15 = vadd.s32 1, %v1164_v62 }
  0xd7   : > { %v420_v17 = vshrl.u32 %v987_v28, %v408_v0  ;;  %v422_v19 = vshll.u32 %v987_v28, %v407_v53  ;;  %v412_v20 = vor.u32 %v411_v10, %v410_v4  ;;  %v415_v21 = vor.u32 %v414_v12, %v413_v8 }
  0xd8   : > { %v418_v23 = vor.u32 %v417_v13, %v416_v9  ;;  %v423_v25 = vshrl.u32 %v988_v35, %v408_v0  ;;  %v349_v16 = vsel %vm347_vm15, %v348_v15, %v1164_v62  ;;  %vm425_vm0 = vcmp.lt.s32.totalorder %v406_v63, 1 }
  0xd9   : > { %v421_v27 = vor.u32 %v420_v17, %v419_v14  ;;  %vm428_vm1 = vcmp.lt.s32.totalorder %v406_v63, 4  ;;  %v350_v22 = vadd.s32 %v349_v16, %v345_v3  ;;  %vm427_vm2 = vcmp.lt.s32.totalorder %v406_v63, 3 }
  0xda   : > { %v424_v24 = vor.u32 %v423_v25, %v422_v19  ;;  %v430_v26 = vsel %vm428_vm1, %v418_v23, 2102212464  ;;  %v409_v29 = vshrl.u32 %v983_v18, %v408_v0  ;;  %v433_v30 = vsel %vm425_vm0, %v412_v20, %v415_v21 }
  0xdb   : > { %v434_v31 = vsel %vm428_vm1, %v421_v27, 920167782  ;;  %v437_v32 = vsel %vm425_vm0, %v415_v21, %v418_v23  ;;  %v351_v33 = vadd.s32 536870912, %v350_v22  ;;  %vm426_vm3 = vcmp.lt.s32.totalorder %v406_v63, 2 }
  0xdc   : > { %v435_v28 = vsel %vm427_vm2, %v418_v23, %v434_v31  ;;  %v438_v34 = vsel %vm428_vm1, %v424_v24, 1326507024  ;;  %v429_v36 = vsel %vm425_vm0, %v409_v29, %v412_v20  ;;  %v431_v35 = vsel %vm427_vm2, %v415_v21, %v430_v26 }
  0xdd   : > { %v436_v37 = vsel %vm426_vm3, %v433_v30, %v435_v28  ;;  %v439_v38 = vsel %vm427_vm2, %v421_v27, %v438_v34  ;;  %v352_v39 = vshrl.u32 %v351_v33, 30  ;;  %v432_v45 = vsel %vm426_vm3, %v429_v36, %v431_v35 }
  0xde   : > { %v440_v40 = vsel %vm426_vm3, %v437_v32, %v439_v38  ;;  %v1174_v41 = vmul.u32.u64.low %v441_v1, %v436_v37  ;;  %v1175_v42 = vmul.u32.u64.high %v441_v1, %v436_v37, %v1174_v41  ;;  %v448_v48 = vmul.u32 %v441_v1, %v432_v45 }
  0xdf   : > { %v1177_v43 = vmul.u32.u64.low %v441_v1, %v440_v40  ;;  %v1178_v44 = vmul.u32.u64.high %v441_v1, %v440_v40, %v1177_v43  ;;  %v353_v18 = vshll.u32 %v352_v39, 30  ;;  %v346_v0 = vadd.s32 %v1163_v61, %v1160_v60 }
  0xe0   : > { %v451_v47 = vadd.s32 1, %v1175_v42  ;;  %vm1193_vm10 = vcmp.le.f32.partialorder %v393_v11, 0.7853982  ;;  %vm1203_vm11 = vcmp.eq.s32.totalorder %v708_v7, 1  ;;  %vm382_vm2 = vweird.f32 %v1126_v54 }
  0xe1   : > { %v354_v46 = vsub.s32 %v350_v22, %v353_v18  ;;  %vm450_vm4 = vc.u32 %v1178_v44, %v1174_v41  ;;  %v449_v16 = vadd.s32 %v1174_v41, %v1178_v44  ;;  %v376_v22 = vsub.s32 4, %v352_v39 }
  0xe2   : > { %v452_v50 = vsel %vm450_vm4, %v451_v47, %v1175_v42 }
  0xe3   : > { %v356_v49 = vsub.s32 0, %v354_v46  ;;  %v453_v51 = vadd.s32 %v452_v50, %v448_v48  ;;  %v377_v28 = vsel %vm292_vm7, %v376_v22, %v352_v39 }
  0xe4   : > { %v379_v37 = vsel %vm291_vm8, 0, %v377_v28 }
  0xe5   : > { %v805_v52 = vmin.u32 %v356_v49, %v354_v46  ;;  %v454_v53 = vadd.s32 536870912, %v453_v51  ;;  %v589_v40 = vadd.s32 3, %v379_v37  ;;  %v383_v44 = vand.u32 3, %v379_v37 }
  0xe7   : > { %v358_v55 = vclz %v805_v52  ;;  %v455_v56 = vshrl.u32 %v454_v53, 30  ;;  %v590_v18 = vand.u32 3, %v589_v40  ;;  %vm388_vm12 = vcmp.eq.s32.totalorder %v383_v44, 2 }
  0xe8   : > { %vm385_vm14 = vcmp.eq.s32.totalorder %v383_v44, 0  ;;  %vm384_vm0 = vcmp.lt.s32.totalorder %v383_v44, 2 }
  0xe9   : > { %v806_v57 = vadd.s32 4294967294, %v358_v55  ;;  %v456_v58 = vshll.u32 %v455_v56, 30  ;;  %v479_v42 = vsub.s32 4, %v455_v56  ;;  %vm595_vm13 = vcmp.eq.s32.totalorder %v590_v18, 2 }
  0xea   : > { %vm592_vm15 = vcmp.eq.s32.totalorder %v590_v18, 0  ;;  %vm591_vm1 = vcmp.lt.s32.totalorder %v590_v18, 2 }
  0xeb   : > { %vm807_vm5 = vcmp.lt.s32.totalorder %v806_v57, 0  ;;  %v457_v63 = vsub.s32 %v453_v51, %v456_v58  ;;  %v480_v45 = vsel %vm395_vm9, %v479_v42, %v455_v56 }
  0xec   : > { %v361_v62 = vsel %vm807_vm5, 0, %v806_v57  ;;  %v482_v50 = vsel %vm1193_vm10, 0, %v480_v45 }
  0xed   : > { %v362_v3 = vsub.s32 32, %v361_v62  ;;  %v366_v1 = vsub.s32 4294967266, %v361_v62  ;;  %v459_v4 = vsub.s32 0, %v457_v63  ;;  %v363_v8 = vshll.u32 %v354_v46, %v361_v62 }
  0xee   : > { %v693_v55 = vadd.s32 3, %v482_v50  ;;  %v486_v62 = vand.u32 3, %v482_v50 }
  0xef   : > { %v364_v9 = vshrl.u32 %v346_v0, %v362_v3  ;;  %v367_v10 = vadd.s32 127, %v366_v1  ;;  %v809_v12 = vmin.u32 %v459_v4, %v457_v63 }
  0xf0   : > { %vm491_vm3 = vcmp.eq.s32.totalorder %v486_v62, 2  ;;  %vm488_vm5 = vcmp.eq.s32.totalorder %v486_v62, 0 }
  0xf1   : > { %v365_v13 = vor.u32 %v364_v9, %v363_v8  ;;  %v368_v14 = vshll.u32 %v367_v10, 23  ;;  %v461_v15 = vclz %v809_v12 }
  0xf3   : > { %v369_v17 = vor.u32 4788187, %v368_v14  ;;  %v810_v19 = vadd.s32 4294967294, %v461_v15  ;;  %v372_v21 = vcvt.s32.f32 %v365_v13 }
  0xf5   : > { %v370_v20 = vand.u32 2147483647, %v369_v17  ;;  %vm811_vm6 = vcmp.lt.s32.totalorder %v810_v19, 0 }
  0xf6   : > { %v464_v25 = vsel %vm811_vm6, 0, %v810_v19 }
  0xf7   : > { %v373_v23 = vmul.f32 %v372_v21, %v370_v20  ;;  %v465_v60 = vsub.s32 32, %v464_v25  ;;  %v469_v61 = vsub.s32 4294967266, %v464_v25  ;;  %v466_v24 = vshll.u32 %v457_v63, %v464_v25 }
  0xf8   : > { %v694_v63 = vand.u32 3, %v693_v55 }
  0xf9   : > { %v374_v27 = vxor.u32 2147483648, %v373_v23  ;;  %v467_v26 = vshrl.u32 %v449_v16, %v465_v60  ;;  %v470_v29 = vadd.s32 127, %v469_v61 }
  0xfa   : > { %vm699_vm4 = vcmp.eq.s32.totalorder %v694_v63, 2  ;;  %vm696_vm6 = vcmp.eq.s32.totalorder %v694_v63, 0 }
  0xfb   : > { %v375_v30 = vsel %vm292_vm7, %v374_v27, %v373_v23  ;;  %v468_v32 = vor.u32 %v467_v26, %v466_v24  ;;  %v471_v33 = vshll.u32 %v470_v29, 23  ;;  %vm487_vm7 = vcmp.lt.s32.totalorder %v486_v62, 2 }
  0xfc   : > { %v378_v31 = vsel %vm291_vm8, %v1126_v54, %v375_v30  ;;  %vm695_vm8 = vcmp.lt.s32.totalorder %v694_v63, 2 }
  0xfd   : > { %905 = vcosq.f32 %v378_v31  ;;  %v472_v34 = vor.u32 4788187, %v471_v33  ;;  %v475_v35 = vcvt.s32.f32 %v468_v32 }
  0xfe   : > { %907 = vsinq.f32 %v378_v31 }
  0xff   : > { %v473_v36 = vand.u32 2147483647, %v472_v34 }
 0x101   : > { %v476_v38 = vmul.f32 %v475_v35, %v473_v36 }
 0x103   : > { %v477_v41 = vxor.u32 2147483648, %v476_v38 }
 0x105   : > { %v478_v43 = vsel %vm395_vm9, %v477_v41, %v476_v38  ;;  %vm485_vm9 = vweird.f32 %v1142_v2 }
 0x106   : > { %v481_v39 = vsel %vm1193_vm10, %v1142_v2, %v478_v43 }
 0x107   : > { %909 = vcosq.f32 %v481_v39 }
 0x108   : > { %911 = vsinq.f32 %v481_v39 }
 0x10a   : > { %v906_v46 = vpop.eup %905 }
 0x10b   : > { %v908_v47 = vpop.eup %907  ;;  %v389_v48 = vxor.u32 2147483648, %v906_v46 }
 0x10c   : > { %v386_v49 = vxor.u32 2147483648, %v908_v47 }
 0x10d   : > { %v390_v51 = vsel %vm388_vm12, %v389_v48, %v908_v47  ;;  %v597_v52 = vsel %vm595_vm13, %v389_v48, %v908_v47 }
 0x10e   : > { %v387_v53 = vsel %vm385_vm14, %v906_v46, %v386_v49  ;;  %v594_v5 = vsel %vm592_vm15, %v906_v46, %v386_v49 }
 0x10f   : > { %v391_v6 = vsel %vm384_vm0, %v387_v53, %v390_v51  ;;  %v598_v7 = vsel %vm591_vm1, %v594_v5, %v597_v52 }
 0x110   : > { %v392_v56 = vsel %vm382_vm2, nan, %v391_v6  ;;  %v599_v57 = vsel %vm382_vm2, nan, %v598_v7 }
 0x111   : > { %v710_v58 = vsel %vm1203_vm11, %v392_v56, %v599_v57 }
 0x112   : > { %712 = vst [vmem:[%s1214_s14] sm:$0xff] %v710_v58 }
 0x114   : > { %v910_v0 = vpop.eup %909 }
 0x115   : > { %v912_v3 = vpop.eup %911  ;;  %v492_v1 = vxor.u32 2147483648, %v910_v0 }
 0x116   : > { %v489_v4 = vxor.u32 2147483648, %v912_v3 }
 0x117   : > { %v493_v54 = vsel %vm491_vm3, %v492_v1, %v912_v3  ;;  %v701_v8 = vsel %vm699_vm4, %v492_v1, %v912_v3 }
 0x118   : > { %v490_v9 = vsel %vm488_vm5, %v910_v0, %v489_v4  ;;  %v698_v10 = vsel %vm696_vm6, %v910_v0, %v489_v4  ;;  %721 = sbr.rel (!%p1045_p5) target bundleno = 312 (0x138), region = 32 }
 0x119   : > { %v494_v12 = vsel %vm487_vm7, %v490_v9, %v493_v54  ;;  %v702_v13 = vsel %vm695_vm8, %v698_v10, %v701_v8 }
 0x11a   : > { %v495_v14 = vsel %vm485_vm9, nan, %v494_v12  ;;  %v703_v15 = vsel %vm485_vm9, nan, %v702_v13 }
 0x11b   : > { %v711_v17 = vsel %vm1203_vm11, %v495_v14, %v703_v15 }
 0x11c   : > { %713 = vst [vmem:[%s1214_s14 + $0x8] sm:$0xff] %v711_v17 }
 0x11d   : > { %s1305_s17 = smov (!%p724_p11, %s723_s17), 2 }
 0x11e   : > { %s1228_s21 = sshll.u32 %s1305_s17, 7 }
 0x11f   : > { %s728_s22 = ssub.s32 256, %s1228_s21 }
 0x120   : > { %729 = vsyncadd %s1223_s16, %s728_s22  ;;  %p823_p12 = scmp.ne.s32.totalorder %s1228_s21, 0  ;;  %s829_s24 = sshll.u32 %s1028_s13, 8 }
 0x121   : > { %s1237_s26 = scalar_lea.hbm %s1285_s2, %s829_s24  ;;  %s734_s23 = sshll.u32 %s1214_s14, 4  ;;  %s1240_s23 = int_to_ptr.vmem [resolvable:$true] %s734_s23 }
 0x122   : > { %s913_s27 = scalar_lea.vmem %s1240_s23, %s1228_s21  ;;  %s989_s28 = smov [#allocation2]  }
 0x123   : > { %p914_p13 = scmp.ne.s32.totalorder %s1240_s23, %s913_s27  ;;  %s917_s29 = sshll.u32 %s989_s28, 4  ;;  %s918_s29 = int_to_ptr.vmem [resolvable:$false] %s917_s29 }
 0x124   : > { %s919_s13 = scalar_lea.vmem %s918_s29, 512  ;;  %p920_p2 = scmp.lt.s32.totalorder %s1240_s23, %s918_s29 }
 0x125   : > { %p915_p0 = pnand %p914_p13, %p823_p12  ;;  %p921_p3 = scmp.lt.s32.totalorder %s919_s13, %s913_s27 }
 0x127   : > { %p916_p1 = pneg %p915_p0  ;;  %p922_p4 = por %p921_p3, %p920_p2 }
 0x129   : > { %p923_p5 = pnand %p922_p4, %p916_p1 }
 0x12b   : > { %926 = shalt.err (!%p923_p5)
}
 0x12c   : > { %s927_s30 = scalar_lea.hbm %s1237_s26, %s1228_s21  ;;  %s931_s5 = scalar_lea.hbm %s1285_s2, 896 }
 0x12d   : > { %p928_p7 = scmp.ne.s32.totalorder %s1237_s26, %s927_s30  ;;  %p932_p10 = scmp.lt.s32.totalorder %s1237_s26, %s1285_s2 }
 0x12e   : > { %p933_p11 = scmp.lt.s32.totalorder %s931_s5, %s927_s30 }
 0x12f   : > { %p929_p8 = pnand %p928_p7, %p823_p12 }
 0x130   : > { %p934_p13 = por %p933_p11, %p932_p10 }
 0x131   : > { %p930_p9 = pneg %p929_p8 }
 0x133   : > { %p935_p0 = pnand %p934_p13, %p930_p9 }
 0x135   : > { %938 = shalt.err (!%p935_p0)
}
 0x136   : > { %s990_s8 = smov 128   ;;  %s991_s14 = smov 8  }
 0x137   : > { %740 = dma.vmem_to_hbm [thread:$0]  (%p823_p12), %s1240_s23, %s1228_s21, %s1237_s26, %s1223_s16, %s990_s8, %s990_s8, %s991_s14  }
 0x138 PF: > { %p843_p1 = scmp.ge.s32.totalorder %s973_s12, 2  ;;  %s749_s17 = sand.u32 1, %s961_s9  }
 0x139   : > { %s750_s22 = scalar_lea.sflag [#allocation3], %s749_s17 }
 0x13a   : > { %p840_p2 = pnand %p843_p1, %p1049_p6 }
 0x13c   : > { %p841_p3 = pneg %p840_p2 }
 0x13e   : > { %956 = dma.done.wait (%p841_p3), %s750_s22, 256  }
 0x13f   : > { %958 = vsyncadd (%p841_p3), %s750_s22, 4294967040  ;;  %p12_p4 = scmp.ge.s32.totalorder %s1032_s15, 6   ;;  %s1300_s9 = smov %s965_s10 }
 0x140   : > { %s1301_s10 = smov %s969_s11  ;;  %s1302_s11 = smov %s1043_s18 }
 0x141   : > { %s1303_s12 = smov %s1032_s15  ;;  %14 = sbr.rel (!%p12_p4) target bundleno = 3 (0x3), region = 63 }
 0x146   :  { %755 = vsyncpa [#allocation3], 1 }
 0x147   :  { %757 = vsyncpa [#allocation3 + $0x1], 1 }

</bundles_post_ra>
